<compile_context>
chip_gen: v7x
topology: tpu7x:2x2x1
jax: 0.10.0
libtpu: 0.0.40
codegen_flags: <defaults>
</compile_context>

<pallas_src>
import jax
import jax.numpy as jnp
from jax.experimental import pallas as pl
from jax.experimental.pallas import tpu as pltpu


def _round_up(x, m):
    return (x + m - 1) // m * m


def _layer_layout(dims):
    """Packed-blob layout.

    dims = (num_obs, hidden..., output_size).
    Returns (width, spans, total_rows) where spans[i] = (row_offset, rows, cols):
    layer i's weight occupies blob[row_offset:row_offset+rows, :cols].
    rows = padded input width of layer i, cols = padded output width.
    """
    n_layers = len(dims) - 1
    cols = [_round_up(dims[i + 1], 128) for i in range(n_layers)]   # padded out width
    rows = [_round_up(dims[0], 128)] + cols[:-1]                    # padded in width
    width = max(cols)
    spans = []
    off = 0
    for i in range(n_layers):
        spans.append((off, rows[i], cols[i]))
        off += _round_up(rows[i], 16)                               # bf16 sublane tile
    total_rows = _round_up(off, 16)
    return width, spans, total_rows


def init_params(key, dims):
    """PyTorch-default U(-1/sqrt(fan_in), 1/sqrt(fan_in)); weights stored (in, out)."""
    n_layers = len(dims) - 1
    keys = jax.random.split(key, 2 * n_layers)
    weights, biases = [], []
    for i in range(n_layers):
        fan_in, fan_out = dims[i], dims[i + 1]
        bound = 1.0 / (fan_in ** 0.5)
        w = jax.random.uniform(keys[2 * i], (fan_in, fan_out), jnp.float32,
                               minval=-bound, maxval=bound)
        b = jax.random.uniform(keys[2 * i + 1], (fan_out,), jnp.float32,
                               minval=-bound, maxval=bound)
        weights.append(w)
        biases.append(b)
    return weights, biases


def pack_params(weights, biases):
    """Pack per-layer (in,out) f32 weights / (out,) f32 biases into two blobs."""
    dims = (weights[0].shape[0],) + tuple(w.shape[1] for w in weights)
    width, spans, total_rows = _layer_layout(dims)
    n_layers = len(weights)
    wblob = jnp.zeros((total_rows, width), jnp.bfloat16)
    bblob = jnp.zeros((n_layers, width), jnp.float32)
    for i, ((off, _rows, _cols), w, b) in enumerate(zip(spans, weights, biases)):
        d_in, d_out = w.shape
        wblob = wblob.at[off:off + d_in, :d_out].set(w.astype(jnp.bfloat16))
        bblob = bblob.at[i, :d_out].set(b.astype(jnp.float32))
    return wblob, bblob


def state_estimator_forward(x, wblob, bblob, dims, *, batch_tile=128):
    """x: [B, num_obs] f32.  wblob: packed bf16 weights.  bblob: packed f32 biases."""
    dims = tuple(int(d) for d in dims)
    n_layers = len(dims) - 1
    width, spans, total_rows = _layer_layout(dims)
    out_size = dims[-1]
    in_pad = spans[0][1]          # padded input feature width (lane-dense)
    out_pad = spans[-1][2]        # padded output width (lane-dense store)
    assert wblob.shape == (total_rows, width)
    assert bblob.shape == (n_layers, width)

    B, num_obs = x.shape
    assert num_obs == dims[0]

    # Batch tiling: weights stay VMEM-resident across tiles; pad B so the grid
    # divides evenly and pad the feature axis to a full 128-lane multiple.
    bt = _round_up(min(batch_tile, B), 8)
    Bp = _round_up(B, bt)
    xp = jnp.pad(x, ((0, Bp - B), (0, in_pad - num_obs)))

    def kernel(x_ref, w_ref, b_ref, o_ref):
        h = x_ref[...]                                   # (bt, in_pad) f32
        b = b_ref[...]                                   # (n_layers, width) f32
        for i, (off, rows, cols) in enumerate(spans):
            w_i = w_ref[off:off + rows, :cols]           # bf16, tile-aligned slice
            h = jnp.dot(h.astype(jnp.bfloat16), w_i,
                        preferred_element_type=jnp.float32)
            h = h + b[i:i + 1, :cols]                    # f32 bias add
            if i < n_layers - 1:
                h = jnp.maximum(h, 0.0)                  # ReLU (f32)
            # Dropout(p=0.2) is identity in eval mode.
        o_ref[...] = h.astype(o_ref.dtype)               # unmasked 128-lane store

    flops = 2 * Bp * sum(r * c for (_o, r, c) in spans)
    bytes_accessed = (xp.size * xp.dtype.itemsize
                      + wblob.size * wblob.dtype.itemsize
                      + bblob.size * bblob.dtype.itemsize
                      + Bp * out_pad * 4)

    out = pl.pallas_call(
        kernel,
        out_shape=jax.ShapeDtypeStruct((Bp, out_pad), x.dtype),
        grid=(Bp // bt,),
        in_specs=[
            pl.BlockSpec((bt, in_pad), lambda i: (i, 0)),           # x tile
            pl.BlockSpec((total_rows, width), lambda i: (0, 0)),    # weights (resident)
            pl.BlockSpec((n_layers, width), lambda i: (0, 0)),      # biases  (resident)
        ],
        out_specs=pl.BlockSpec((bt, out_pad), lambda i: (i, 0)),
        compiler_params=pltpu.CompilerParams(
            dimension_semantics=("parallel",)),          # shard batch tiles across TCs (v7x)
        cost_estimate=pl.CostEstimate(
            flops=flops, transcendentals=0, bytes_accessed=bytes_accessed),
    )(xp, wblob, bblob)

    return out[:B, :out_size]


def _reference_forward(x, weights, biases):
    """Pure-JAX reference mirroring the kernel math (bf16 matmul operands, f32 acc)."""
    n_layers = len(weights)
    h = x
    for i, (w, b) in enumerate(zip(weights, biases)):
        h = jnp.dot(h.astype(jnp.bfloat16), w.astype(jnp.bfloat16),
                    preferred_element_type=jnp.float32) + b[None, :]
        if i < n_layers - 1:
            h = jnp.maximum(h, 0.0)
    return h


if __name__ == "__main__":
    key = jax.random.PRNGKey(0)
    k_param, k_x = jax.random.split(key)

    num_obs, hidden, output_size = 240, (256, 128, 64), 6
    dims = (num_obs, *hidden, output_size)
    batch = 16

    weights, biases = init_params(k_param, dims)
    wblob, bblob = pack_params(weights, biases)
    x = jax.random.normal(k_x, (batch, num_obs), jnp.float32)

    # batch_tile=8 -> 2 grid steps, exercising the resident-weight batch grid.
    out = state_estimator_forward(x, wblob, bblob, dims, batch_tile=8)
    out = jax.block_until_ready(out)

    ref = _reference_forward(x, weights, biases)
    assert out.shape == (batch, output_size)
    assert jnp.allclose(out, ref, atol=1e-2, rtol=1e-2), \
        float(jnp.max(jnp.abs(out - ref)))

    print("KERNEL_OK")
</pallas_src>

<mosaic_0001>
module attributes {stable_mosaic.version = 11 : i64} {
  func.func @kernel(%arg0: i32, %arg1: memref<8x256xf32, #tpu.memory_space<vmem>>, %arg2: memref<768x256xbf16, #tpu.memory_space<vmem>>, %arg3: memref<4x256xf32, #tpu.memory_space<vmem>>, %arg4: memref<8x128xf32, #tpu.memory_space<vmem>>) attributes {dimension_semantics = [#tpu.dimension_semantics<parallel>], iteration_bounds = array<i64: 2>, scalar_prefetch = 0 : i64, scratch_operands = 0 : i64, tpu.core_type = #tpu.core_type<tc>, window_params = [{transform_indices = @transform_0, window_bounds = array<i64: 8, 256>}, {pipeline_mode = #tpu.pipeline_mode<synchronous>, transform_indices = @transform_1, window_bounds = array<i64: 768, 256>}, {pipeline_mode = #tpu.pipeline_mode<synchronous>, transform_indices = @transform_2, window_bounds = array<i64: 4, 256>}, {transform_indices = @transform_3, window_bounds = array<i64: 8, 128>}]} {
    %c0 = arith.constant 0 : index
    %c0_0 = arith.constant 0 : index
    %0 = vector.load %arg1[%c0, %c0_0] : memref<8x256xf32, #tpu.memory_space<vmem>>, vector<8x256xf32>
    %c0_1 = arith.constant 0 : index
    %c0_2 = arith.constant 0 : index
    %1 = vector.load %arg3[%c0_1, %c0_2] : memref<4x256xf32, #tpu.memory_space<vmem>>, vector<4x256xf32>
    %c0_3 = arith.constant 0 : index
    %c0_4 = arith.constant 0 : index
    %2 = vector.load %arg2[%c0_3, %c0_4] : memref<768x256xbf16, #tpu.memory_space<vmem>>, vector<256x256xbf16>
    %3 = arith.truncf %0 : vector<8x256xf32> to vector<8x256xbf16>
    %cst = arith.constant dense<0.000000e+00> : vector<8x256xf32>
    %4 = tpu.matmul %3, %2, %cst {dimension_numbers = #tpu.dot_dimension_numbers<[1], [0], [0], [1], [0, 0, 1, 1], [], []>} : vector<8x256xbf16>, vector<256x256xbf16>, vector<8x256xf32> -> vector<8x256xf32>
    %5 = vector.extract_strided_slice %1 {offsets = [0, 0], sizes = [1, 256], strides = [1, 1]} : vector<4x256xf32> to vector<1x256xf32>
    %6 = vector.broadcast %5 : vector<1x256xf32> to vector<8x256xf32>
    %7 = arith.addf %4, %6 : vector<8x256xf32>
    %cst_5 = arith.constant 0.000000e+00 : f32
    %8 = vector.broadcast %cst_5 : f32 to vector<8x256xf32>
    %9 = arith.maximumf %7, %8 : vector<8x256xf32>
    %c256 = arith.constant 256 : index
    %c0_6 = arith.constant 0 : index
    %10 = vector.load %arg2[%c256, %c0_6] : memref<768x256xbf16, #tpu.memory_space<vmem>>, vector<256x128xbf16>
    %11 = arith.truncf %9 : vector<8x256xf32> to vector<8x256xbf16>
    %cst_7 = arith.constant dense<0.000000e+00> : vector<8x128xf32>
    %12 = tpu.matmul %11, %10, %cst_7 {dimension_numbers = #tpu.dot_dimension_numbers<[1], [0], [0], [1], [0, 0, 1, 1], [], []>} : vector<8x256xbf16>, vector<256x128xbf16>, vector<8x128xf32> -> vector<8x128xf32>
    %13 = vector.extract_strided_slice %1 {offsets = [1, 0], sizes = [1, 128], strides = [1, 1]} : vector<4x256xf32> to vector<1x128xf32>
    %14 = vector.broadcast %13 : vector<1x128xf32> to vector<8x128xf32>
    %15 = arith.addf %12, %14 : vector<8x128xf32>
    %cst_8 = arith.constant 0.000000e+00 : f32
    %16 = vector.broadcast %cst_8 : f32 to vector<8x128xf32>
    %17 = arith.maximumf %15, %16 : vector<8x128xf32>
    %c512 = arith.constant 512 : index
    %c0_9 = arith.constant 0 : index
    %18 = vector.load %arg2[%c512, %c0_9] : memref<768x256xbf16, #tpu.memory_space<vmem>>, vector<128x128xbf16>
    %19 = arith.truncf %17 : vector<8x128xf32> to vector<8x128xbf16>
    %cst_10 = arith.constant dense<0.000000e+00> : vector<8x128xf32>
    %20 = tpu.matmul %19, %18, %cst_10 {dimension_numbers = #tpu.dot_dimension_numbers<[1], [0], [0], [1], [0, 0, 1, 1], [], []>} : vector<8x128xbf16>, vector<128x128xbf16>, vector<8x128xf32> -> vector<8x128xf32>
    %21 = vector.extract_strided_slice %1 {offsets = [2, 0], sizes = [1, 128], strides = [1, 1]} : vector<4x256xf32> to vector<1x128xf32>
    %22 = vector.broadcast %21 : vector<1x128xf32> to vector<8x128xf32>
    %23 = arith.addf %20, %22 : vector<8x128xf32>
    %cst_11 = arith.constant 0.000000e+00 : f32
    %24 = vector.broadcast %cst_11 : f32 to vector<8x128xf32>
    %25 = arith.maximumf %23, %24 : vector<8x128xf32>
    %c640 = arith.constant 640 : index
    %c0_12 = arith.constant 0 : index
    %26 = vector.load %arg2[%c640, %c0_12] : memref<768x256xbf16, #tpu.memory_space<vmem>>, vector<128x128xbf16>
    %27 = arith.truncf %25 : vector<8x128xf32> to vector<8x128xbf16>
    %cst_13 = arith.constant dense<0.000000e+00> : vector<8x128xf32>
    %28 = tpu.matmul %27, %26, %cst_13 {dimension_numbers = #tpu.dot_dimension_numbers<[1], [0], [0], [1], [0, 0, 1, 1], [], []>} : vector<8x128xbf16>, vector<128x128xbf16>, vector<8x128xf32> -> vector<8x128xf32>
    %29 = vector.extract_strided_slice %1 {offsets = [3, 0], sizes = [1, 128], strides = [1, 1]} : vector<4x256xf32> to vector<1x128xf32>
    %30 = vector.broadcast %29 : vector<1x128xf32> to vector<8x128xf32>
    %31 = arith.addf %28, %30 : vector<8x128xf32>
    %c0_14 = arith.constant 0 : index
    %c0_15 = arith.constant 0 : index
    %32 = vector.load %arg4[%c0_14, %c0_15] : memref<8x128xf32, #tpu.memory_space<vmem>>, vector<8x128xf32>
    tpu.vector_store %arg4[%c0_14, %c0_15], %31 {strides = array<i32>} : memref<8x128xf32, #tpu.memory_space<vmem>>, vector<8x128xf32>,
    return
  }
  func.func @transform_0(%arg0: i32) -> (i32, i32) {
    %c0_i32 = arith.constant 0 : i32
    %c0_i32_0 = arith.constant 0 : i32
    return %arg0, %c0_i32 : i32, i32
  }
  func.func @transform_1(%arg0: i32) -> (i32, i32) {
    %c0_i32 = arith.constant 0 : i32
    %c0_i32_0 = arith.constant 0 : i32
    %c0_i32_1 = arith.constant 0 : i32
    return %c0_i32, %c0_i32_0 : i32, i32
  }
  func.func @transform_2(%arg0: i32) -> (i32, i32) {
    %c0_i32 = arith.constant 0 : i32
    %c0_i32_0 = arith.constant 0 : i32
    %c0_i32_1 = arith.constant 0 : i32
    return %c0_i32, %c0_i32_0 : i32, i32
  }
  func.func @transform_3(%arg0: i32) -> (i32, i32) {
    %c0_i32 = arith.constant 0 : i32
    %c0_i32_0 = arith.constant 0 : i32
    return %arg0, %c0_i32 : i32, i32
  }
}

</mosaic_0001>

<bundles_post_ra>
// kernel: tpu_custom_call.1
= control target key start
LH: loop header
LB: loop body
LE: loop exit
PB: predicated region body
PF: predicated region fallthrough
CT: control target
= control target key end

     0   :  { %8 = vsyncpa [#allocation3], 0  ;;  %s1737_s0 = inlined_call_operand.hbm [shape: f32[16,256], index: 0, kind: input, shape index: {}]   ;;  %s1738_s1 = inlined_call_operand.hbm [shape: bf16[768,256], index: 1, kind: input, shape index: {}]   ;;  %s1739_s2 = inlined_call_operand.hbm [shape: f32[4,256], index: 2, kind: input, shape index: {}]   ;;  %s1740_s3 = inlined_call_operand.hbm [shape: f32[16,128], index: 3, kind: output, shape index: {}]  }
   0x1   :  { %10 = vsyncpa [#allocation3 + $0x1], 0 }
   0x2   :  { %11 = vsyncpa [#allocation6], 0 }
   0x3   :  { %12 = vsyncpa [#allocation4], 0 }
   0x4   :  { %14 = vsyncpa [#allocation4 + $0x1], 0  ;;  %s1471_s12 = smov 0   ;;  %s1473_s13 = smov 0  }
   0x5   :  { %s1475_s14 = smov 0   ;;  %s1477_s15 = smov 0  }
   0x6 LB: > { %s1492_s16 = sadd.s32 4294967295, %s1441_s15   ;;  %s972_s17 = sadd.s32 4294967294, %s1441_s15   ;;  %s1441_s15 = sphi %s1477_s15, %s1760_s15   ;;  %s1437_s14 = sphi %s1475_s14, %s1759_s14   ;;  %s1433_s13 = sphi %s1473_s13, %s1758_s13   ;;  %s1429_s12 = sphi %s1471_s12, %s1757_s12  }
   0x7   : > { %p40_p0 = scmp.ne.s32.totalorder %s1433_s13, %s1429_s12  ;;  %p1741_p1 = scmp.eq.s32.totalorder %s1492_s16, 0 }
   0x8   : > { %p112_p3 = scmp.eq.s32.totalorder %s972_s17, 1  ;;  %p973_p5 = scmp.ge.s32.totalorder %s1441_s15, 1 }
   0x9   : > { %p1501_p4 = por %p1741_p1, %p40_p0  ;;  %p119_p7 = scmp.lt.s32.totalorder %s1441_s15, 3 }
   0xa   : > { %p1506_p6 = por %p112_p3, %p40_p0  ;;  %s1443_s21 = smov [#allocation5]  }
   0xb   : > { %s1744_s18 = scalar_select %p1501_p4, 1, 0 }
   0xc   : > { %s1745_s19 = scalar_select %p1506_p6, 1, 0 }
   0xd   : > { %p1511_p8 = pnand %p973_p5, %p119_p7  ;;  %s131_s22 = sshll.u32 %s1443_s21, 4  ;;  %s1515_s22 = int_to_ptr.vmem [resolvable:$true] %s131_s22 }
   0xe   : > { %s1444_s24 = smov [#allocation7]   ;;  %s1285_s28 = scalar_lea.hbm %s1738_s1, 12288 }
   0xf   : > { %p1146_p9 = pneg %p1511_p8  ;;  %s145_s25 = sshll.u32 %s1444_s24, 4  ;;  %s1526_s25 = int_to_ptr.vmem [resolvable:$true] %s145_s25 }
  0x10   : > { %p1286_p12 = scmp.ne.s32.totalorder %s1738_s1, %s1285_s28  ;;  %p1292_p5 = scmp.lt.u32.totalorder %s1285_s28, %s1738_s1 }
  0x11   : > { %p1522_p11 = pnand %p1146_p9, %p1741_p1 }
  0x13   : > { %p1287_p13 = pneg %p1522_p11 }
  0x15   : > { %p1288_p0 = pnand %p1287_p13, %p1286_p12 }
  0x17   : > { %p1289_p3 = pneg %p1288_p0 }
  0x19   : > { %p1294_p7 = pnand %p1292_p5, %p1289_p3 }
  0x1b   : > { %1297 = shalt.err (!%p1294_p7)
}
  0x1c   : > { %s1298_s6 = scalar_lea.vmem %s1515_s22, 12288  ;;  %p1306_p2 = scmp.lt.s32.totalorder %s1515_s22, %s1515_s22 }
  0x1d   : > { %p1299_p9 = scmp.ne.s32.totalorder %s1515_s22, %s1298_s6  ;;  %p1307_p12 = scmp.lt.s32.totalorder %s1298_s6, %s1298_s6 }
  0x1f   : > { %p1301_p10 = pnand %p1299_p9, %p1287_p13  ;;  %p1308_p0 = por %p1307_p12, %p1306_p2 }
  0x21   : > { %p1302_p1 = pneg %p1301_p10 }
  0x23   : > { %p1309_p6 = pnand %p1308_p0, %p1302_p1 }
  0x25   : > { %1312 = shalt.err (!%p1309_p6)
}
  0x26   : > { %s1445_s7 = smov 128   ;;  %s1446_s8 = smov 8  }
  0x27   : > { %1149 = dma.hbm_to_vmem [thread:$0]  (!%p1522_p11), %s1738_s1, 12288, %s1515_s22, [#allocation6], %s1445_s7, %s1445_s7, %s1446_s8  }
  0x28   : > { %s1313_s21 = scalar_lea.hbm %s1739_s2, 128 }
  0x29   : > { %p1314_p2 = scmp.ne.s32.totalorder %s1739_s2, %s1313_s21  ;;  %p1320_p10 = scmp.lt.u32.totalorder %s1313_s21, %s1739_s2 }
  0x2b   : > { %p1316_p1 = pnand %p1314_p2, %p1287_p13 }
  0x2d   : > { %p1317_p6 = pneg %p1316_p1 }
  0x2f   : > { %p1322_p3 = pnand %p1320_p10, %p1317_p6 }
  0x31   : > { %1325 = shalt.err (!%p1322_p3)
}
  0x32   : > { %s1326_s22 = scalar_lea.vmem %s1526_s25, 128  ;;  %p1334_p12 = scmp.lt.s32.totalorder %s1526_s25, %s1526_s25 }
  0x33   : > { %p1327_p5 = scmp.ne.s32.totalorder %s1526_s25, %s1326_s22  ;;  %p1335_p0 = scmp.lt.s32.totalorder %s1326_s22, %s1326_s22 }
  0x35   : > { %p1329_p7 = pnand %p1327_p5, %p1287_p13  ;;  %p1336_p2 = por %p1335_p0, %p1334_p12 }
  0x37   : > { %p1330_p9 = pneg %p1329_p7 }
  0x39   : > { %p1337_p1 = pnand %p1336_p2, %p1330_p9 }
  0x3b   : > { %1340 = shalt.err (!%p1337_p1)
}
  0x3c   : > { %1152 = dma.hbm_to_vmem [thread:$0]  (!%p1522_p11), %s1739_s2, 128, %s1526_s25, [#allocation6]  }
  0x3d   : > { %s1581_s4 = sadd.s32 1, %s1441_s15   ;;  %s27_s23 = sadd.s32 1, %s1437_s14 }
  0x3e   : > { %s24_s5 = ssub.s32 %s1441_s15, %s1581_s4  ;;  %p34_p13 = scmp.ne.s32.totalorder %s1437_s14, %s1433_s13 }
  0x3f   : > { %p25_p6 = scmp.eq.s32.totalorder %s24_s5, 0  ;;  %p35_p10 = scmp.eq.s32.totalorder %s1441_s15, 0 }
  0x40   : > { %p1748_p3 = scmp.eq.s32.totalorder %s1492_s16, 1  ;;  %p1163_p7 = scmp.lt.s32.totalorder %s1441_s15, 2 }
  0x41   : > { %s1597_s7 = scalar_select %p25_p6, %s1437_s14, %s27_s23  }
  0x42   : > { %p1591_p5 = por %p1748_p3, %p34_p13  ;;  %p36_p9 = por %p35_p10, %p34_p13 }
  0x43   : > { %s156_s8 = sand.u32 1, %s1437_s14   ;;  %s1053_s25 = sshll.u32 %s1441_s15, 8 }
  0x44   : > { %s1749_s6 = scalar_select %p1591_p5, 1, 0 }
  0x45   : > { %s977_s9 = sshll.u32 %s156_s8, 4  ;;  %s1604_s17 = scalar_lea.hbm %s1737_s0, %s1053_s25 }
  0x46   : > { %s160_s21 = scalar_lea.vmem [#allocation2], %s977_s9  ;;  %p1608_p11 = pnand %p1163_p7, %p36_p9 }
  0x47   : > { %s168_s24 = sshll.u32 %s160_s21, 4  ;;  %s157_s27 = scalar_lea.sflag [#allocation3], %s156_s8  ;;  %s1606_s24 = int_to_ptr.vmem [resolvable:$true] %s168_s24 }
  0x48   : > { %s1341_s28 = scalar_lea.hbm %s1604_s17, 256  ;;  %p1343_p0 = pneg %p1608_p11 }
  0x49   : > { %p1342_p12 = scmp.ne.s32.totalorder %s1604_s17, %s1341_s28  ;;  %s1346_s30 = scalar_lea.hbm %s1737_s0, 512 }
  0x4a   : > { %p1347_p13 = scmp.lt.u32.totalorder %s1604_s17, %s1737_s0  ;;  %p1348_p6 = scmp.lt.u32.totalorder %s1346_s30, %s1341_s28 }
  0x4b   : > { %p1344_p2 = pnand %p1343_p0, %p1342_p12  ;;  %p1350_p3 = scmp.lt.u32.totalorder %s1341_s28, %s1604_s17 }
  0x4c   : > { %p1349_p10 = por %p1348_p6, %p1347_p13 }
  0x4d   : > { %p1345_p1 = pneg %p1344_p2 }
  0x4e   : > { %p1351_p7 = por %p1350_p3, %p1349_p10 }
  0x50   : > { %p1352_p9 = pnand %p1351_p7, %p1345_p1 }
  0x52   : > { %1355 = shalt.err (!%p1352_p9)
}
  0x53   : > { %s1356_s8 = scalar_lea.vmem %s1606_s24, 256  ;;  %s1447_s9 = smov [#allocation2]  }
  0x54   : > { %p1357_p12 = scmp.ne.s32.totalorder %s1606_s24, %s1356_s8  ;;  %s1361_s25 = sshll.u32 %s1447_s9, 4  ;;  %s1362_s25 = int_to_ptr.vmem [resolvable:$false] %s1361_s25 }
  0x55   : > { %s1363_s10 = scalar_lea.vmem %s1362_s25, 512  ;;  %p1364_p4 = scmp.lt.s32.totalorder %s1606_s24, %s1362_s25 }
  0x56   : > { %p1359_p2 = pnand %p1357_p12, %p1343_p0  ;;  %p1365_p13 = scmp.lt.s32.totalorder %s1363_s10, %s1356_s8 }
  0x58   : > { %p1360_p5 = pneg %p1359_p2  ;;  %p1366_p6 = por %p1365_p13, %p1364_p4 }
  0x5a   : > { %p1367_p10 = pnand %p1366_p6, %p1360_p5 }
  0x5c   : > { %1370 = shalt.err (!%p1367_p10)
}
  0x5d   : > { %1156 = dma.hbm_to_vmem [thread:$0]  (!%p1608_p11), %s1604_s17, 256, %s1606_s24, %s157_s27  }
  0x5e   : > { %177 = sbr.rel (%p1511_p8) target bundleno = 1057 (0x421), region = 32  ;;  %s1640_s11 = sand.u32 (!%p1511_p8), 1, %s1433_s13  }
  0x5f   : > { %s981_s21 = sshll.u32 (!%p1511_p8), %s1640_s11, 4  ;;  %s180_s28 = scalar_lea.sflag (!%p1511_p8), [#allocation3], %s1640_s11 }
  0x60   : > { %s1644_s22 = scalar_lea.vmem (!%p1511_p8), [#allocation2], %s981_s21  ;;  %p1751_p4 = scmp.ne.s32.totalorder (!%p1511_p8), %s1744_s18, 0 }
  0x65   : > { %1416 = dma.done.wait (%p1751_p4), %s180_s28, 256  }
  0x66   : > { %1418 = vsyncadd (%p1751_p4), %s180_s28, 4294967040  ;;  %p1752_p5 = scmp.eq.s32.totalorder %s1492_s16, 0 }
  0x68   : > { %1420 = dma.done.wait (%p1752_p5), [#allocation6], 12416   ;;  %p1753_p8 = pmov %p1752_p5 }
  0x69   : > { %v1205_v0 = vld [vmem:[#allocation5 + $0x4] ss:$8 sps:$4 sm:$0xff]   ;;  %v1207_v1 = vld [vmem:[#allocation5] ss:$8 sps:$4 sm:$0xff]   ;;  %v1208_v2 = vld [vmem:[#allocation5 + $0x14] ss:$8 sps:$4 sm:$0xff]   ;;  %v253_v53 = vlaneseq }
  0x6a   : > { %1422 = vsyncadd (%p1753_p8), [#allocation6], 4294954880  ;;  %431 = vmatprep.subr.bf16.mxu0 %v1205_v0  ;;  %v1210_v3 = vld [vmem:[#allocation5 + $0x10] ss:$8 sps:$4 sm:$0xff]   ;;  %v1211_v4 = vld [vmem:[#allocation5 + $0x24] ss:$8 sps:$4 sm:$0xff]  }
  0x6b   : > { %432 = vmatpush1.bf16.msra.mxu0 %v1207_v1  ;;  %v1213_v5 = vld [vmem:[#allocation5 + $0x20] ss:$8 sps:$4 sm:$0xff]   ;;  %v1214_v6 = vld [vmem:[#allocation5 + $0x34] ss:$8 sps:$4 sm:$0xff]   ;;  %v1216_v7 = vld [vmem:[#allocation5 + $0x30] ss:$8 sps:$4 sm:$0xff]  }
  0x6c   : > { %433 = vmatprep.subr.bf16.mxu0 %v1208_v2  ;;  %v1217_v8 = vld [vmem:[#allocation5 + $0x44] ss:$8 sps:$4 sm:$0xff]   ;;  %v1219_v9 = vld [vmem:[#allocation5 + $0x40] ss:$8 sps:$4 sm:$0xff]   ;;  %v1220_v10 = vld [vmem:[#allocation5 + $0x54] ss:$8 sps:$4 sm:$0xff]  }
  0x6d   : > { %v1222_v11 = vld [vmem:[#allocation5 + $0x50] ss:$8 sps:$4 sm:$0xff]   ;;  %v1223_v12 = vld [vmem:[#allocation5 + $0x64] ss:$8 sps:$4 sm:$0xff]   ;;  %v1225_v13 = vld [vmem:[#allocation5 + $0x60] ss:$8 sps:$4 sm:$0xff]  }
  0x6e   : > { %v216_v14 = vld [vmem:[%s1644_s22 + $0x8] sm:$0xff]  ;;  %v215_v46 = vld [vmem:[%s1644_s22] sm:$0xff]  ;;  %v1448_v52 = vmov 0.0   ;;  %v1658_v54 = vshrl.u32 %v253_v53, 7  ;;  %vm1449_vm0 = vmmov 0   ;;  %s984_s18 = sshll.u32 %s1640_s11, 3 }
  0x6f   : > { %434 = vmatpush1.bf16.msra.mxu0 %v1210_v3  ;;  %v1226_v15 = vld [vmem:[#allocation5 + $0x74] ss:$8 sps:$4 sm:$0xff]   ;;  %v251_v16 = vpack.c.bf16 %v216_v14, %v216_v14  ;;  %v1253_v17 = vld [vmem:[#allocation5 + $0x180] ss:$8 sps:$4 sm:$0xff]   ;;  %v1255_v19 = vld [vmem:[#allocation5 + $0x190] ss:$8 sps:$4 sm:$0xff]   ;;  %v250_v47 = vpack.c.bf16 %v215_v46, %v215_v46 }
  0x70   : > { %435 = vmatprep.subr.bf16.mxu0 %v1211_v4  ;;  %v1254_v18 = vld [vmem:[#allocation5 + $0x100] ss:$8 sps:$4 sm:$0xff]   ;;  %v1228_v20 = vld [vmem:[#allocation5 + $0x70] ss:$8 sps:$4 sm:$0xff]   ;;  %1054 = vmatprep.subr.bf16.mxu1 %v1253_v17  ;;  %v1229_v23 = vld [vmem:[#allocation5 + $0x84] ss:$8 sps:$4 sm:$0xff]  }
  0x71   : > { %463 = vmatprep.mubr.bf16.mxu0 %v251_v16  ;;  %1055 = vmatpush3.bf16.msra.mxu1 %v1254_v18  ;;  %v1256_v21 = vld [vmem:[#allocation5 + $0x110] ss:$8 sps:$4 sm:$0xff]   ;;  %v1257_v22 = vld [vmem:[#allocation5 + $0x1a0] ss:$8 sps:$4 sm:$0xff]   ;;  %v1232_v27 = vld [vmem:[#allocation5 + $0x94] ss:$8 sps:$4 sm:$0xff]  }
  0x72   : > { %1056 = vmatprep.subr.bf16.mxu1 %v1255_v19  ;;  %v1231_v24 = vld [vmem:[#allocation5 + $0x80] ss:$8 sps:$4 sm:$0xff]   ;;  %v1259_v26 = vld [vmem:[#allocation5 + $0x1b0] ss:$8 sps:$4 sm:$0xff]   ;;  %v1235_v30 = vld [vmem:[#allocation5 + $0xa4] ss:$8 sps:$4 sm:$0xff]  }
  0x73   : > { %436 = vmatpush1.bf16.msra.mxu0 %v1213_v5  ;;  %v1258_v25 = vld [vmem:[#allocation5 + $0x120] ss:$8 sps:$4 sm:$0xff]   ;;  %v1234_v28 = vld [vmem:[#allocation5 + $0x90] ss:$8 sps:$4 sm:$0xff]   ;;  %v1238_v35 = vld [vmem:[#allocation5 + $0xb4] ss:$8 sps:$4 sm:$0xff]  }
  0x74   : > { %437 = vmatprep.subr.bf16.mxu0 %v1214_v6  ;;  %v1260_v29 = vld [vmem:[#allocation5 + $0x130] ss:$8 sps:$4 sm:$0xff]   ;;  %v1261_v31 = vld [vmem:[#allocation5 + $0x1c0] ss:$8 sps:$4 sm:$0xff]   ;;  %v1241_v38 = vld [vmem:[#allocation5 + $0xc4] ss:$8 sps:$4 sm:$0xff]  }
  0x75   : > { %1057 = vmatpush3.bf16.msra.mxu1 %v1256_v21  ;;  %v1262_v32 = vld [vmem:[#allocation5 + $0x140] ss:$8 sps:$4 sm:$0xff]   ;;  %v1263_v34 = vld [vmem:[#allocation5 + $0x1d0] ss:$8 sps:$4 sm:$0xff]   ;;  %v1244_v40 = vld [vmem:[#allocation5 + $0xd4] ss:$8 sps:$4 sm:$0xff]  }
  0x76   : > { %1058 = vmatprep.subr.bf16.mxu1 %v1257_v22  ;;  %v1237_v33 = vld [vmem:[#allocation5 + $0xa0] ss:$8 sps:$4 sm:$0xff]   ;;  %v1264_v36 = vld [vmem:[#allocation5 + $0x150] ss:$8 sps:$4 sm:$0xff]   ;;  %v1247_v42 = vld [vmem:[#allocation5 + $0xe4] ss:$8 sps:$4 sm:$0xff]  }
  0x77   : > { %438 = vmatpush1.bf16.msra.mxu0 %v1216_v7  ;;  %v1240_v37 = vld [vmem:[#allocation5 + $0xb0] ss:$8 sps:$4 sm:$0xff]   ;;  %v1243_v39 = vld [vmem:[#allocation5 + $0xc0] ss:$8 sps:$4 sm:$0xff]   ;;  %v1250_v44 = vld [vmem:[#allocation5 + $0xf4] ss:$8 sps:$4 sm:$0xff]  }
  0x78   : > { %439 = vmatprep.subr.bf16.mxu0 %v1217_v8  ;;  %v1246_v41 = vld [vmem:[#allocation5 + $0xd0] ss:$8 sps:$4 sm:$0xff]   ;;  %v1249_v43 = vld [vmem:[#allocation5 + $0xe0] ss:$8 sps:$4 sm:$0xff]   ;;  %v255_v55 = vsub.s32 0, %v1658_v54  ;;  %v259_v57 = vsub.s32 4, %v1658_v54 }
  0x79   : > { %1059 = vmatpush3.bf16.msra.mxu1 %v1258_v25  ;;  %v1252_v45 = vld [vmem:[#allocation5 + $0xf0] ss:$8 sps:$4 sm:$0xff]   ;;  %v1265_v48 = vld [vmem:[#allocation5 + $0x1e0] ss:$8 sps:$4 sm:$0xff]   ;;  %v510_v22 = vsub.s32 1, %v1658_v54  ;;  %s1050_s20 = sshll.u32 %s1492_s16, 7 }
  0x7a   : > { %1060 = vmatprep.subr.bf16.mxu1 %v1259_v26  ;;  %v1266_v49 = vld [vmem:[#allocation5 + $0x160] ss:$8 sps:$4 sm:$0xff]   ;;  %v1267_v50 = vld [vmem:[#allocation5 + $0x1f0] ss:$8 sps:$4 sm:$0xff]   ;;  %s213_s17 = scalar_lea.vmem [#allocation8], %s984_s18  ;;  %s1693_s29 = scalar_lea.hbm %s1740_s3, %s1050_s20 }
  0x7b   : > { %440 = vmatpush1.bf16.msra.mxu0 %v1219_v9  ;;  %v1268_v51 = vld [vmem:[#allocation5 + $0x170] ss:$8 sps:$4 sm:$0xff]   ;;  %v1661_v56 = vld [vmem:[#allocation7] sm:$0xff]  ;;  %s883_s24 = sshll.u32 %s213_s17, 4  ;;  %s870_s30 = scalar_lea.sflag [#allocation4], %s1640_s11  ;;  %s1695_s24 = int_to_ptr.vmem [resolvable:$true] %s883_s24 }
  0x7c   : > { %441 = vmatprep.subr.bf16.mxu0 %v1220_v10  ;;  %v256_v58 = vrot.slane %v1661_v56, %v255_v55  ;;  %v260_v59 = vrot.slane %v1661_v56, %v259_v57  ;;  %v1269_v7 = vld [vmem:[#allocation5 + $0x200] ss:$8 sps:$4 sm:$0xff]   ;;  %v1270_v9 = vld [vmem:[#allocation5 + $0x210] ss:$8 sps:$4 sm:$0xff]   ;;  %s1371_s16 = scalar_lea.vmem %s1695_s24, 128  ;;  %p1754_p0 = scmp.ne.s32.totalorder %s1749_s6, 0 }
  0x7d   : > { %1061 = vmatpush3.bf16.msra.mxu1 %v1260_v29  ;;  %v1271_v10 = vld [vmem:[#allocation5 + $0x220] ss:$8 sps:$4 sm:$0xff]   ;;  %v1278_v17 = vld [vmem:[#allocation5 + $0x290] ss:$8 sps:$4 sm:$0xff]   ;;  %p1372_p11 = scmp.ne.s32.totalorder %s1695_s24, %s1371_s16  ;;  %s1450_s23 = smov [#allocation8]  }
  0x7e   : > { %1062 = vmatprep.subr.bf16.mxu1 %v1261_v31  ;;  %v266_v60 = vrot.slane %v256_v58, %v255_v55  ;;  %v270_v61 = vrot.slane %v260_v59, %v255_v55  ;;  %v1275_v14 = vld [vmem:[#allocation5 + $0x260] ss:$8 sps:$4 sm:$0xff]   ;;  %v1280_v19 = vld [vmem:[#allocation5 + $0x2b0] ss:$8 sps:$4 sm:$0xff]   ;;  %s1375_s5 = sshll.u32 %s1450_s23, 4  ;;  %s1376_s5 = int_to_ptr.vmem [resolvable:$false] %s1375_s5 }
  0x7f   : > { %442 = vmatpush1.bf16.msra.mxu0 %v1222_v11  ;;  %v1272_v11 = vld [vmem:[#allocation5 + $0x230] ss:$8 sps:$4 sm:$0xff]   ;;  %v1277_v16 = vld [vmem:[#allocation5 + $0x280] ss:$8 sps:$4 sm:$0xff]   ;;  %p1373_p1 = pnand %p1372_p11, %p1754_p0  ;;  %s1377_s8 = scalar_lea.vmem %s1376_s5, 256 }
  0x80   : > { %443 = vmatprep.subr.bf16.mxu0 %v1223_v12  ;;  %v1273_v12 = vld [vmem:[#allocation5 + $0x240] ss:$8 sps:$4 sm:$0xff]   ;;  %v1282_v21 = vld [vmem:[#allocation5 + $0x2d0] ss:$8 sps:$4 sm:$0xff]   ;;  %p1378_p7 = scmp.lt.s32.totalorder %s1695_s24, %s1376_s5  ;;  %p1379_p9 = scmp.lt.s32.totalorder %s1377_s8, %s1371_s16 }
  0x81   : > { %1063 = vmatpush3.bf16.msra.mxu1 %v1262_v32  ;;  %v1279_v18 = vld [vmem:[#allocation5 + $0x2a0] ss:$8 sps:$4 sm:$0xff]   ;;  %p1374_p3 = pneg %p1373_p1 }
  0x82   : > { %1064 = vmatprep.subr.bf16.mxu1 %v1263_v34  ;;  %v1283_v32 = vld [vmem:[#allocation5 + $0x2e0] ss:$8 sps:$4 sm:$0xff]   ;;  %v668_v34 = vsub.s32 2, %v1658_v54  ;;  %p1380_p12 = por %p1379_p9, %p1378_p7 }
  0x83   : > { %444 = vmatpush1.bf16.msra.mxu0 %v1225_v13  ;;  %v1274_v13 = vld [vmem:[#allocation5 + $0x250] ss:$8 sps:$4 sm:$0xff]  }
  0x84   : > { %445 = vmatprep.subr.bf16.mxu0 %v1226_v15  ;;  %v1276_v15 = vld [vmem:[#allocation5 + $0x270] ss:$8 sps:$4 sm:$0xff]   ;;  %p1381_p2 = pnand %p1380_p12, %p1374_p3 }
  0x85   : > { %1065 = vmatpush3.bf16.msra.mxu1 %v1264_v36 }
  0x86   : > { %1066 = vmatprep.subr.bf16.mxu1 %v1265_v48 }
  0x87   : > { %446 = vmatpush1.bf16.msra.mxu0 %v1228_v20  ;;  %v1281_v20 = vld [vmem:[#allocation5 + $0x2c0] ss:$8 sps:$4 sm:$0xff]  }
  0x88   : > { %447 = vmatprep.subr.bf16.mxu0 %v1229_v23 }
  0x89   : > { %1067 = vmatpush3.bf16.msra.mxu1 %v1266_v49 }
  0x8a   : > { %1068 = vmatprep.subr.bf16.mxu1 %v1267_v50 }
  0x8b   : > { %448 = vmatpush1.bf16.msra.mxu0 %v1231_v24  ;;  %v511_v24 = vrot.slane %v1661_v56, %v510_v22 }
  0x8c   : > { %449 = vmatprep.subr.bf16.mxu0 %v1232_v27 }
  0x8d   : > { %1069 = vmatpush3.bf16.msra.mxu1 %v1268_v51 }
  0x8e   : > { %1094 = vmatprep.subr.bf16.mxu1 %v1448_v52 }
  0x8f   : > { %450 = vmatpush1.bf16.msra.mxu0 %v1234_v28 }
  0x90   : > { %451 = vmatprep.subr.bf16.mxu0 %v1235_v30 }
  0x93   : > { %452 = vmatpush1.bf16.msra.mxu0 %v1237_v33  ;;  %v1284_v33 = vld [vmem:[#allocation5 + $0x2f0] ss:$8 sps:$4 sm:$0xff]  }
  0x94   : > { %453 = vmatprep.subr.bf16.mxu0 %v1238_v35  ;;  %v669_v35 = vrot.slane %v1661_v56, %v668_v34 }
  0x97   : > { %454 = vmatpush1.bf16.msra.mxu0 %v1240_v37 }
  0x98   : > { %455 = vmatprep.subr.bf16.mxu0 %v1241_v38 }
  0x9b   : > { %456 = vmatpush1.bf16.msra.mxu0 %v1243_v39 }
  0x9c   : > { %457 = vmatprep.subr.bf16.mxu0 %v1244_v40 }
  0x9f   : > { %458 = vmatpush1.bf16.msra.mxu0 %v1246_v41 }
  0xa0   : > { %459 = vmatprep.subr.bf16.mxu0 %v1247_v42 }
  0xa3   : > { %460 = vmatpush1.bf16.msra.mxu0 %v1249_v43  ;;  %v778_v43 = vsub.s32 3, %v1658_v54 }
  0xa4   : > { %461 = vmatprep.subr.bf16.mxu0 %v1250_v44 }
  0xa5   : > { %v779_v44 = vrot.slane %v1661_v56, %v778_v43 }
  0xa7   : > { %462 = vmatpush1.bf16.msra.mxu0 %v1252_v45 }
  0xa8   : > { %1114 = vmatprep.subr.bf16.mxu0 %v1448_v52 }
  0xaa   : > { %464 = vmatmul.mubr.bf16.vlgmr.msra.gmra.mrb[0].mxu0 %v250_v47 }
  0xab   : > { %1130 = vmatprep.mubr.msk.bf16.mxu0 %vm1449_vm0, %v1448_v52  ;;  %1115 = vmatpush3.bf16.msra.mxu0 %v1277_v16 }
  0xac   : > { %1116 = vmatprep.subr.bf16.mxu0 %v1448_v52 }
  0xaf   : > { %1117 = vmatpush3.bf16.msra.mxu0 %v1278_v17 }
  0xb0   : > { %1118 = vmatprep.subr.bf16.mxu0 %v1448_v52 }
  0xb3   : > { %1119 = vmatpush3.bf16.msra.mxu0 %v1279_v18 }
  0xb4   : > { %1120 = vmatprep.subr.bf16.mxu0 %v1448_v52 }
  0xb7   : > { %1121 = vmatpush3.bf16.msra.mxu0 %v1280_v19 }
  0xb8   : > { %1122 = vmatprep.subr.bf16.mxu0 %v1448_v52 }
  0xbb   : > { %1123 = vmatpush3.bf16.msra.mxu0 %v1281_v20 }
  0xbc   : > { %1124 = vmatprep.subr.bf16.mxu0 %v1448_v52 }
  0xbf   : > { %1125 = vmatpush3.bf16.msra.mxu0 %v1282_v21 }
  0xc0   : > { %1126 = vmatprep.subr.bf16.mxu0 %v1448_v52 }
  0xc3   : > { %1127 = vmatpush3.bf16.msra.mxu0 %v1283_v32 }
  0xc4   : > { %1128 = vmatprep.subr.bf16.mxu0 %v1448_v52 }
  0xc7   : > { %1129 = vmatpush3.bf16.msra.mxu0 %v1284_v33 }
 0x17d   : > { %v465_v62 = vpop.f32.mrb[0].mxu0 }
 0x17e   : > { %v466_v63 = vadd.f32 %v465_v62, %v266_v60  ;;  %v467_v0 = vpop.f32.mrb[1].mxu0 }
 0x17f   : > { %v468_v1 = vadd.f32 %v467_v0, %v270_v61  ;;  %v469_v2 = vpop.f32.mrb[2].mxu0 }
 0x180   : > { %v472_v3 = vmax.f32 %v466_v63, 0.0  ;;  %v470_v4 = vpop.f32.mrb[3].mxu0 }
 0x181   : > { %v473_v5 = vmax.f32 %v468_v1, 0.0 }
 0x182   : > { %v506_v8 = vpack.c.bf16 %v472_v3, %v472_v3 }
 0x183   : > { %v507_v6 = vpack.c.bf16 %v473_v5, %v473_v5 }
 0x185   : > { %640 = vmatprep.mubr.bf16.mxu1 %v507_v6 }
 0x186   : > { %641 = vmatmul.mubr.bf16.vlgmr.msra.gmra.mrb[0].mxu1 %v506_v8 }
 0x187   : > { %1095 = vmatpush3.bf16.msra.mxu1 %v1269_v7  ;;  %1110 = vmatprep.mubr.msk.bf16.mxu1 %vm1449_vm0, %v1448_v52 }
 0x188   : > { %1096 = vmatprep.subr.bf16.mxu1 %v1448_v52 }
 0x18b   : > { %1097 = vmatpush3.bf16.msra.mxu1 %v1270_v9 }
 0x18c   : > { %1098 = vmatprep.subr.bf16.mxu1 %v1448_v52 }
 0x18f   : > { %1099 = vmatpush3.bf16.msra.mxu1 %v1271_v10 }
 0x190   : > { %1100 = vmatprep.subr.bf16.mxu1 %v1448_v52 }
 0x193   : > { %1101 = vmatpush3.bf16.msra.mxu1 %v1272_v11 }
 0x194   : > { %1102 = vmatprep.subr.bf16.mxu1 %v1448_v52 }
 0x197   : > { %1103 = vmatpush3.bf16.msra.mxu1 %v1273_v12 }
 0x198   : > { %1104 = vmatprep.subr.bf16.mxu1 %v1448_v52 }
 0x19b   : > { %1105 = vmatpush3.bf16.msra.mxu1 %v1274_v13 }
 0x19c   : > { %1106 = vmatprep.subr.bf16.mxu1 %v1448_v52 }
 0x19f   : > { %1107 = vmatpush3.bf16.msra.mxu1 %v1275_v14 }
 0x1a0   : > { %1108 = vmatprep.subr.bf16.mxu1 %v1448_v52 }
 0x1a3   : > { %1109 = vmatpush3.bf16.msra.mxu1 %v1276_v15 }
 0x259   : > { %v1070_v23 = vpop.f32.mrb[0].mxu1 }
 0x25a   : > { %v1071_v25 = vpop.f32.mrb[1].mxu1 }
 0x25b   : > { %v1072_v26 = vadd.f32 %v1071_v25, %v1070_v23  ;;  %v1073_v27 = vpop.f32.mrb[2].mxu1 }
 0x25c   : > { %v1074_v28 = vpop.f32.mrb[3].mxu1 }
 0x25d   : > { %v643_v29 = vadd.f32 %v1072_v26, %v511_v24 }
 0x25f   : > { %v648_v30 = vmax.f32 %v643_v29, 0.0 }
 0x261   : > { %v665_v31 = vpack.c.bf16 %v648_v30, %v648_v30 }
 0x263   : > { %1111 = vmatmul.mubr.bf16.vlgmr.msra.gmra.mrb[4].mxu1 %v665_v31 }
 0x336   : > { %v752_v36 = vpop.f32.mrb[4].mxu1 }
 0x337   : > { %v753_v37 = vadd.f32 %v752_v36, %v669_v35  ;;  %v1112_v38 = vpop.f32.mrb[5].mxu1 }
 0x338   : > { %v755_v39 = vpop.f32.mrb[6].mxu1 }
 0x339   : > { %v758_v40 = vmax.f32 %v753_v37, 0.0  ;;  %v1113_v41 = vpop.f32.mrb[7].mxu1 }
 0x33b   : > { %v775_v42 = vpack.c.bf16 %v758_v40, %v758_v40 }
 0x33d   : > { %1131 = vmatmul.mubr.bf16.vlgmr.msra.gmra.mrb[4].mxu0 %v775_v42 }
 0x410   : > { %v862_v45 = vpop.f32.mrb[4].mxu0 }
 0x411   : > { %v863_v46 = vadd.f32 %v862_v45, %v779_v44  ;;  %v1132_v47 = vpop.f32.mrb[5].mxu0 }
 0x412   : > { %v865_v48 = vpop.f32.mrb[6].mxu0 }
 0x413   : > { %868 = vst [vmem:[%s213_s17] sm:$0xff] %v863_v46  ;;  %v1133_v49 = vpop.f32.mrb[7].mxu0 }
 0x414   : > { %1384 = shalt.err (!%p1381_p2)
}
 0x415   : > { %s1385_s9 = scalar_lea.hbm %s1693_s29, 128  ;;  %s1389_s11 = scalar_lea.hbm %s1740_s3, 256 }
 0x416   : > { %p1386_p13 = scmp.ne.s32.totalorder %s1693_s29, %s1385_s9  ;;  %p1390_p4 = scmp.lt.u32.totalorder %s1693_s29, %s1740_s3 }
 0x417   : > { %p1391_p5 = scmp.lt.u32.totalorder %s1389_s11, %s1385_s9  ;;  %p1393_p11 = scmp.lt.u32.totalorder %s1385_s9, %s1693_s29 }
 0x418   : > { %p1387_p6 = pnand %p1386_p13, %p1754_p0 }
 0x419   : > { %p1392_p8 = por %p1391_p5, %p1390_p4 }
 0x41a   : > { %p1388_p10 = pneg %p1387_p6 }
 0x41b   : > { %p1394_p1 = por %p1393_p11, %p1392_p8 }
 0x41d   : > { %p1395_p3 = pnand %p1394_p1, %p1388_p10 }
 0x41f   : > { %1398 = shalt.err (!%p1395_p3)
}
 0x420   : > { %1144 = dma.vmem_to_hbm [thread:$0]  (%p1754_p0), %s1695_s24, 128, %s1693_s29, %s870_s30  }
 0x421 PF: > { %s895_s22 = sand.u32 1, %s1429_s12   ;;  %p1755_p7 = scmp.ne.s32.totalorder %s1745_s19, 0 }
 0x422   : > { %p1756_p9 = scmp.ge.s32.totalorder %s1441_s15, 2  ;;  %s896_s18 = scalar_lea.sflag [#allocation4], %s895_s22 }
 0x424   : > { %p1158_p12 = pnand %p1756_p9, %p1755_p7 }
 0x426   : > { %1424 = dma.done.wait (!%p1158_p12), %s896_s18, 128  }
 0x427   : > { %1426 = vsyncadd (!%p1158_p12), %s896_s18, 4294967168  ;;  %p17_p2 = scmp.ge.s32.totalorder %s1581_s4, 4   ;;  %s1757_s12 = smov %s1433_s13 }
 0x428   : > { %s1758_s13 = smov %s1437_s14  ;;  %s1759_s14 = smov %s1597_s7 }
 0x429   : > { %s1760_s15 = smov %s1581_s4  ;;  %19 = sbr.rel (!%p17_p2) target bundleno = 6 (0x6), region = 85 }
 0x430   :  { %901 = vsyncpa [#allocation3], 1 }
 0x431   :  { %903 = vsyncpa [#allocation3 + $0x1], 1 }
 0x432   :  { %904 = vsyncpa [#allocation6], 1 }
 0x433   :  { %905 = vsyncpa [#allocation4], 1 }
 0x434   :  { %907 = vsyncpa [#allocation4 + $0x1], 1 }

</bundles_post_ra>
